<compile_context>
chip_gen: v7x
topology: tpu7x:2x2x1
jax: 0.10.0
libtpu: 0.0.40
codegen_flags: <defaults>
</compile_context>

<pallas_src>
import functools

import jax
import jax.numpy as jnp
from jax.experimental import pallas as pl
from jax.experimental.pallas import tpu as pltpu

BN_EPS = 1e-5
K5 = 5                              # 5x5 window covers both branches (3x3 = centre taps)
VMEM_LIMIT_BYTES = 32 * 1024 * 1024  # explicit scoped-VMEM limit (safe on v5e/v6e/v7x)
TILE_VMEM_BUDGET = 10 * 1024 * 1024  # target working set, leaves headroom under the limit


def _round_up(x, m):
    return (x + m - 1) // m * m


def _pick_tile_m(m, k_pad, c_pad, budget_bytes=TILE_VMEM_BUDGET, max_rows=4096):
    """Rows per tile from a VMEM budget (covers both passes, double-buffered)."""
    # pass 1 per row: x tile (2 * k_pad * 2B) + bf16 act out (2 * c_pad * 2B)
    # pass 2 per row: bf16 act in (2 * c_pad * 2B) + f32 out (2 * c_pad * 4B)
    per_row = max(4 * k_pad + 4 * c_pad, 12 * c_pad)
    w_bytes = 2 * k_pad * c_pad * 2              # double-buffered combined weight
    avail = max(budget_bytes - w_bytes, 64 * 1024)
    rows = max(8, min(max_rows, avail // per_row))
    rows = (rows // 8) * 8
    return min(rows, _round_up(m, 8))


# ----------------------------- kernels ---------------------------------------


def _conv_stats_kernel(x_ref, w_ref, act_ref, sum_ref, sq_ref):
    """Pass 1: one fused-K MXU matmul -> cache bf16 activation + per-tile BN partials.

    x_ref:   (tile_m, K_pad)  bf16   full 25-tap im2col rows (one row per output pixel)
    w_ref:   (K_pad, C_PAD)   bf16   combined [3x3 | 5x5] weights
    act_ref: (tile_m, C_PAD)  bf16   cached conv output (consumed by pass 2)
    sum_ref: (1, 1, C_PAD)    f32    per-tile per-channel sum
    sq_ref:  (1, 1, C_PAD)    f32    per-tile per-channel sum of squares
    """
    acc = jnp.dot(x_ref[...], w_ref[...], preferred_element_type=jnp.float32)
    act_ref[...] = acc.astype(act_ref.dtype)
    sum_ref[...] = jnp.sum(acc, axis=0, keepdims=True).reshape(sum_ref.shape)
    sq_ref[...] = jnp.sum(acc * acc, axis=0, keepdims=True).reshape(sq_ref.shape)


def _bn_relu_kernel(act_ref, scale_ref, shift_ref, o_ref):
    """Pass 2: elementwise folded-BN scale/shift + ReLU over the cached activation."""
    y = act_ref[...].astype(jnp.float32) * scale_ref[...] + shift_ref[...]
    o_ref[...] = jnp.maximum(y, 0.0).astype(o_ref.dtype)


# ----------------------------- module wrapper ---------------------------------


def inception_module(x_nchw, params):
    """InceptionModule forward. Input NCHW, output NCHW (channel concat of branches)."""
    n, c_in, h, w = x_nchw.shape
    c_out = params["w3"].shape[0]

    c_pad = max(128, _round_up(2 * c_out, 128))     # lane-dense output channels
    k_raw = K5 * K5 * c_in                          # full 25-tap contraction width
    k_pad = _round_up(k_raw, 128)                   # lane-dense contraction width

    m = n * h * w                                   # output pixels (N packed into M)
    tile_m = _pick_tile_m(m, k_pad, c_pad)
    m_pad = _round_up(m, tile_m)
    n_tiles = m_pad // tile_m

    # ---- JAX glue: full 25-tap im2col (single matmul per tile in the kernel) ----
    x_nhwc = jnp.transpose(x_nchw, (0, 2, 3, 1))                      # (N,H,W,Cin)
    xp = jnp.pad(x_nhwc, ((0, 0), (2, 2), (2, 2), (0, 0)))            # pad=2 covers both
    cols = [xp[:, kh:kh + h, kw:kw + w, :] for kh in range(K5) for kw in range(K5)]
    patches = jnp.stack(cols, axis=3)                                 # (N,H,W,25,Cin)
    x2d = patches.reshape(m, k_raw)
    x2d = jnp.pad(x2d, ((0, m_pad - m), (0, k_pad - k_raw)))          # zero rows/cols OK
    x2d = x2d.astype(jnp.bfloat16)

    # Combined weights: channels [0,Cout) = 3x3 branch (centre taps), [Cout,2Cout) = 5x5.
    w3t = jnp.transpose(params["w3"], (2, 3, 1, 0))                   # (3,3,Cin,Cout)
    w5t = jnp.transpose(params["w5"], (2, 3, 1, 0))                   # (5,5,Cin,Cout)
    wc = jnp.zeros((K5, K5, c_in, c_pad), jnp.float32)
    wc = wc.at[1:4, 1:4, :, 0:c_out].set(w3t)
    wc = wc.at[:, :, :, c_out:2 * c_out].set(w5t)
    wc = wc.reshape(k_raw, c_pad)
    wc = jnp.pad(wc, ((0, k_pad - k_raw), (0, 0))).astype(jnp.bfloat16)

    gamma = jnp.zeros((1, c_pad), jnp.float32)
    gamma = gamma.at[0, 0:c_out].set(params["g3"]).at[0, c_out:2 * c_out].set(params["g5"])
    beta = jnp.zeros((1, c_pad), jnp.float32)
    beta = beta.at[0, 0:c_out].set(params["b3"]).at[0, c_out:2 * c_out].set(params["b5"])

    x_spec = pl.BlockSpec((tile_m, k_pad), lambda t: (t, 0))
    w_spec = pl.BlockSpec((k_pad, c_pad), lambda t: (0, 0))
    act_spec = pl.BlockSpec((tile_m, c_pad), lambda t: (t, 0))
    part_spec = pl.BlockSpec((1, 1, c_pad), lambda t: (t, 0, 0))
    vec_spec = pl.BlockSpec((1, c_pad), lambda t: (0, 0))

    # ---- Pass 1: conv matmul, cache bf16 activation, per-tile BN partial sums ----
    act, sums, sqs = pl.pallas_call(
        _conv_stats_kernel,
        out_shape=[
            jax.ShapeDtypeStruct((m_pad, c_pad), jnp.bfloat16),
            jax.ShapeDtypeStruct((n_tiles, 1, c_pad), jnp.float32),
            jax.ShapeDtypeStruct((n_tiles, 1, c_pad), jnp.float32),
        ],
        grid=(n_tiles,),
        in_specs=[x_spec, w_spec],
        out_specs=[act_spec, part_spec, part_spec],
        compiler_params=pltpu.CompilerParams(
            dimension_semantics=("parallel",), vmem_limit_bytes=VMEM_LIMIT_BYTES),
        cost_estimate=pl.CostEstimate(
            flops=2 * m_pad * k_pad * c_pad, transcendentals=0,
            bytes_accessed=(m_pad * k_pad * 2 + k_pad * c_pad * 2
                            + m_pad * c_pad * 2 + 2 * n_tiles * c_pad * 4)),
    )(x2d, wc)

    # ---- Tiny per-channel glue: reduce partials, fold BN into one scale/shift ----
    m_total = jnp.float32(m)                         # padded zero rows contribute 0
    mean = jnp.sum(sums, axis=0) / m_total           # (1, C_PAD)
    var = jnp.maximum(jnp.sum(sqs, axis=0) / m_total - mean * mean, 0.0)
    scale = gamma * jax.lax.rsqrt(var + BN_EPS)
    shift = beta - mean * scale

    # ---- Pass 2: elementwise folded BN + ReLU over the cached activation ---------
    out2d = pl.pallas_call(
        _bn_relu_kernel,
        out_shape=jax.ShapeDtypeStruct((m_pad, c_pad), jnp.float32),
        grid=(n_tiles,),
        in_specs=[act_spec, vec_spec, vec_spec],
        out_specs=act_spec,
        compiler_params=pltpu.CompilerParams(
            dimension_semantics=("parallel",), vmem_limit_bytes=VMEM_LIMIT_BYTES),
        cost_estimate=pl.CostEstimate(
            flops=2 * m_pad * c_pad, transcendentals=0,
            bytes_accessed=m_pad * c_pad * 2 + 2 * c_pad * 4 + m_pad * c_pad * 4),
    )(act, scale, shift)

    out_nhwc = out2d[:m, :2 * c_out].reshape(n, h, w, 2 * c_out)
    return jnp.transpose(out_nhwc, (0, 3, 1, 2))      # back to NCHW


# ----------------------------- reference / params -----------------------------


def init_params(key, c_in, c_out):
    k1, k2 = jax.random.split(key)
    return {
        # Conv weights in PyTorch layout (Cout, Cin, KH, KW), bias=False.
        "w3": 0.1 * jax.random.normal(k1, (c_out, c_in, 3, 3), jnp.float32),
        "w5": 0.1 * jax.random.normal(k2, (c_out, c_in, 5, 5), jnp.float32),
        # BatchNorm2d default init: weight=1, bias=0.
        "g3": jnp.ones((c_out,), jnp.float32),
        "b3": jnp.zeros((c_out,), jnp.float32),
        "g5": jnp.ones((c_out,), jnp.float32),
        "b5": jnp.zeros((c_out,), jnp.float32),
    }


def _reference(x_nchw, params):
    """Pure-JAX (XLA) reference of the PyTorch module for a tolerance check."""
    def branch(wgt, g, b, pad):
        y = jax.lax.conv_general_dilated(
            x_nchw, wgt, window_strides=(1, 1), padding=[(pad, pad), (pad, pad)],
            dimension_numbers=("NCHW", "OIHW", "NCHW"))
        mean = jnp.mean(y, axis=(0, 2, 3), keepdims=True)
        var = jnp.mean((y - mean) ** 2, axis=(0, 2, 3), keepdims=True)
        yn = (y - mean) * jax.lax.rsqrt(var + BN_EPS)
        yn = yn * g.reshape(1, -1, 1, 1) + b.reshape(1, -1, 1, 1)
        return jnp.maximum(yn, 0.0)
    o1 = branch(params["w3"], params["g3"], params["b3"], 1)
    o2 = branch(params["w5"], params["g5"], params["b5"], 2)
    return jnp.concatenate([o1, o2], axis=1)


if __name__ == "__main__":
    key = jax.random.PRNGKey(0)
    kx, kp = jax.random.split(key)

    N, C_IN, H, W = 2, 4, 16, 16
    C_OUT = 8

    x = jax.random.normal(kx, (N, C_IN, H, W), jnp.float32)
    params = init_params(kp, C_IN, C_OUT)

    out = jax.jit(inception_module)(x, params)
    out = jax.block_until_ready(out)

    assert out.shape == (N, 2 * C_OUT, H, W), out.shape
    assert out.dtype == jnp.float32
    assert bool(jnp.all(out >= 0.0))          # ReLU output is non-negative

    # Loose tolerance: kernel uses bf16 matmul operands and a bf16 activation cache.
    ref = _reference(x, params)
    max_diff = float(jnp.max(jnp.abs(out - ref)))
    assert max_diff < 1e-1, f"mismatch vs reference: {max_diff}"

    print("KERNEL_OK")
</pallas_src>

<mosaic_0001>
module attributes {stable_mosaic.version = 11 : i64} {
  func.func @_conv_stats_kernel(%arg0: i32, %arg1: memref<512x128xbf16, #tpu.memory_space<vmem>>, %arg2: memref<128x128xbf16, #tpu.memory_space<vmem>>, %arg3: memref<512x128xbf16, #tpu.memory_space<vmem>>, %arg4: memref<1x1x128xf32, #tpu.memory_space<vmem>>, %arg5: memref<1x1x128xf32, #tpu.memory_space<vmem>>) attributes {dimension_semantics = [#tpu.dimension_semantics<parallel>], iteration_bounds = array<i64: 1>, scalar_prefetch = 0 : i64, scratch_operands = 0 : i64, tpu.core_type = #tpu.core_type<tc>, window_params = [{transform_indices = @transform_0, window_bounds = array<i64: 512, 128>}, {pipeline_mode = #tpu.pipeline_mode<synchronous>, transform_indices = @transform_1, window_bounds = array<i64: 128, 128>}, {transform_indices = @transform_2, window_bounds = array<i64: 512, 128>}, {transform_indices = @transform_3, window_bounds = array<i64: 1, 1, 128>}, {transform_indices = @transform_4, window_bounds = array<i64: 1, 1, 128>}]} {
    %c0 = arith.constant 0 : index
    %c0_0 = arith.constant 0 : index
    %0 = vector.load %arg1[%c0, %c0_0] : memref<512x128xbf16, #tpu.memory_space<vmem>>, vector<512x128xbf16>
    %c0_1 = arith.constant 0 : index
    %c0_2 = arith.constant 0 : index
    %1 = vector.load %arg2[%c0_1, %c0_2] : memref<128x128xbf16, #tpu.memory_space<vmem>>, vector<128x128xbf16>
    %cst = arith.constant dense<0.000000e+00> : vector<512x128xf32>
    %2 = tpu.matmul %0, %1, %cst {dimension_numbers = #tpu.dot_dimension_numbers<[1], [0], [0], [1], [0, 0, 1, 1], [], []>} : vector<512x128xbf16>, vector<128x128xbf16>, vector<512x128xf32> -> vector<512x128xf32>
    %3 = arith.truncf %2 : vector<512x128xf32> to vector<512x128xbf16>
    %c0_3 = arith.constant 0 : index
    %c0_4 = arith.constant 0 : index
    %4 = vector.load %arg3[%c0_3, %c0_4] : memref<512x128xbf16, #tpu.memory_space<vmem>>, vector<512x128xbf16>
    tpu.vector_store %arg3[%c0_3, %c0_4], %3 {strides = array<i32>} : memref<512x128xbf16, #tpu.memory_space<vmem>>, vector<512x128xbf16>,
    %cst_5 = arith.constant dense<0.000000e+00> : vector<128xf32>
    %5 = vector.multi_reduction <add>, %2, %cst_5 [0] : vector<512x128xf32> to vector<128xf32>
    %6 = vector.shape_cast %5 : vector<128xf32> to vector<1x128xf32>
    %7 = vector.shape_cast %6 : vector<1x128xf32> to vector<1x1x128xf32>
    %c0_6 = arith.constant 0 : index
    %c0_7 = arith.constant 0 : index
    %c0_8 = arith.constant 0 : index
    %8 = vector.load %arg4[%c0_6, %c0_7, %c0_8] : memref<1x1x128xf32, #tpu.memory_space<vmem>>, vector<1x1x128xf32>
    tpu.vector_store %arg4[%c0_6, %c0_7, %c0_8], %7 {strides = array<i32>} : memref<1x1x128xf32, #tpu.memory_space<vmem>>, vector<1x1x128xf32>,
    %9 = arith.mulf %2, %2 : vector<512x128xf32>
    %cst_9 = arith.constant dense<0.000000e+00> : vector<128xf32>
    %10 = vector.multi_reduction <add>, %9, %cst_9 [0] : vector<512x128xf32> to vector<128xf32>
    %11 = vector.shape_cast %10 : vector<128xf32> to vector<1x128xf32>
    %12 = vector.shape_cast %11 : vector<1x128xf32> to vector<1x1x128xf32>
    %c0_10 = arith.constant 0 : index
    %c0_11 = arith.constant 0 : index
    %c0_12 = arith.constant 0 : index
    %13 = vector.load %arg5[%c0_10, %c0_11, %c0_12] : memref<1x1x128xf32, #tpu.memory_space<vmem>>, vector<1x1x128xf32>
    tpu.vector_store %arg5[%c0_10, %c0_11, %c0_12], %12 {strides = array<i32>} : memref<1x1x128xf32, #tpu.memory_space<vmem>>, vector<1x1x128xf32>,
    return
  }
  func.func @transform_0(%arg0: i32) -> (i32, i32) {
    %c0_i32 = arith.constant 0 : i32
    %c0_i32_0 = arith.constant 0 : i32
    return %arg0, %c0_i32 : i32, i32
  }
  func.func @transform_1(%arg0: i32) -> (i32, i32) {
    %c0_i32 = arith.constant 0 : i32
    %c0_i32_0 = arith.constant 0 : i32
    %c0_i32_1 = arith.constant 0 : i32
    return %c0_i32, %c0_i32_0 : i32, i32
  }
  func.func @transform_2(%arg0: i32) -> (i32, i32) {
    %c0_i32 = arith.constant 0 : i32
    %c0_i32_0 = arith.constant 0 : i32
    return %arg0, %c0_i32 : i32, i32
  }
  func.func @transform_3(%arg0: i32) -> (i32, i32, i32) {
    %c0_i32 = arith.constant 0 : i32
    %c0_i32_0 = arith.constant 0 : i32
    %c0_i32_1 = arith.constant 0 : i32
    return %arg0, %c0_i32, %c0_i32_0 : i32, i32, i32
  }
  func.func @transform_4(%arg0: i32) -> (i32, i32, i32) {
    %c0_i32 = arith.constant 0 : i32
    %c0_i32_0 = arith.constant 0 : i32
    %c0_i32_1 = arith.constant 0 : i32
    return %arg0, %c0_i32, %c0_i32_0 : i32, i32, i32
  }
}

module attributes {stable_mosaic.version = 11 : i64} {
  func.func @_bn_relu_kernel(%arg0: i32, %arg1: memref<512x128xbf16, #tpu.memory_space<vmem>>, %arg2: memref<1x128xf32, #tpu.memory_space<vmem>>, %arg3: memref<1x128xf32, #tpu.memory_space<vmem>>, %arg4: memref<512x128xf32, #tpu.memory_space<vmem>>) attributes {dimension_semantics = [#tpu.dimension_semantics<parallel>], iteration_bounds = array<i64: 1>, scalar_prefetch = 0 : i64, scratch_operands = 0 : i64, tpu.core_type = #tpu.core_type<tc>, window_params = [{transform_indices = @transform_0, window_bounds = array<i64: 512, 128>}, {pipeline_mode = #tpu.pipeline_mode<synchronous>, transform_indices = @transform_1, window_bounds = array<i64: 1, 128>}, {pipeline_mode = #tpu.pipeline_mode<synchronous>, transform_indices = @transform_2, window_bounds = array<i64: 1, 128>}, {transform_indices = @transform_3, window_bounds = array<i64: 512, 128>}]} {
    %c0 = arith.constant 0 : index
    %c0_0 = arith.constant 0 : index
    %0 = vector.load %arg1[%c0, %c0_0] : memref<512x128xbf16, #tpu.memory_space<vmem>>, vector<512x128xbf16>
    %1 = arith.extf %0 : vector<512x128xbf16> to vector<512x128xf32>
    %c0_1 = arith.constant 0 : index
    %c0_2 = arith.constant 0 : index
    %2 = vector.load %arg2[%c0_1, %c0_2] : memref<1x128xf32, #tpu.memory_space<vmem>>, vector<1x128xf32>
    %3 = vector.broadcast %2 : vector<1x128xf32> to vector<512x128xf32>
    %4 = arith.mulf %1, %3 : vector<512x128xf32>
    %c0_3 = arith.constant 0 : index
    %c0_4 = arith.constant 0 : index
    %5 = vector.load %arg3[%c0_3, %c0_4] : memref<1x128xf32, #tpu.memory_space<vmem>>, vector<1x128xf32>
    %6 = vector.broadcast %5 : vector<1x128xf32> to vector<512x128xf32>
    %7 = arith.addf %4, %6 : vector<512x128xf32>
    %cst = arith.constant 0.000000e+00 : f32
    %8 = vector.broadcast %cst : f32 to vector<512x128xf32>
    %9 = arith.maximumf %7, %8 : vector<512x128xf32>
    %c0_5 = arith.constant 0 : index
    %c0_6 = arith.constant 0 : index
    %10 = vector.load %arg4[%c0_5, %c0_6] : memref<512x128xf32, #tpu.memory_space<vmem>>, vector<512x128xf32>
    tpu.vector_store %arg4[%c0_5, %c0_6], %9 {strides = array<i32>} : memref<512x128xf32, #tpu.memory_space<vmem>>, vector<512x128xf32>,
    return
  }
  func.func @transform_0(%arg0: i32) -> (i32, i32) {
    %c0_i32 = arith.constant 0 : i32
    %c0_i32_0 = arith.constant 0 : i32
    return %arg0, %c0_i32 : i32, i32
  }
  func.func @transform_1(%arg0: i32) -> (i32, i32) {
    %c0_i32 = arith.constant 0 : i32
    %c0_i32_0 = arith.constant 0 : i32
    %c0_i32_1 = arith.constant 0 : i32
    return %c0_i32, %c0_i32_0 : i32, i32
  }
  func.func @transform_2(%arg0: i32) -> (i32, i32) {
    %c0_i32 = arith.constant 0 : i32
    %c0_i32_0 = arith.constant 0 : i32
    %c0_i32_1 = arith.constant 0 : i32
    return %c0_i32, %c0_i32_0 : i32, i32
  }
  func.func @transform_3(%arg0: i32) -> (i32, i32) {
    %c0_i32 = arith.constant 0 : i32
    %c0_i32_0 = arith.constant 0 : i32
    return %arg0, %c0_i32 : i32, i32
  }
}

</mosaic_0001>

<bundles_post_ra>
// kernel: inception_module.2
= control target key start
LH: loop header
LB: loop body
LE: loop exit
PB: predicated region body
PF: predicated region fallthrough
CT: control target
= control target key end

     0   :  { %s2134_s1 = inlined_call_operand.vmem [shape: bf16[128,128], index: 1, kind: input, shape index: {}]   ;;  %s2135_s0 = inlined_call_operand.vmem [shape: bf16[512,128], index: 0, kind: input, shape index: {}]   ;;  %s2136_s2 = inlined_call_operand.vmem [shape: bf16[512,128], index: 2, kind: output, shape index: {0}]   ;;  %s2137_s3 = inlined_call_operand.vmem [shape: f32[1,1,128], index: 3, kind: output, shape index: {1}]   ;;  %s2138_s4 = inlined_call_operand.vmem [shape: f32[1,1,128], index: 4, kind: output, shape index: {2}]  }
   0x1   :  { %v1655_v0 = vld [vmem:[%s2134_s1] sm:$0xff]   ;;  %v1656_v1 = vld [vmem:[%s2134_s1 + $0x8] sm:$0xff]   ;;  %v1657_v2 = vld [vmem:[%s2134_s1 + $0x10] sm:$0xff]  }
   0x2   :  { %1559 = vmatprep.subr.bf16.mxu0 %v1655_v0  ;;  %1639 = vmatprep.subr.bf16.mxu1 %v1655_v0  ;;  %v1658_v3 = vld [vmem:[%s2134_s1 + $0x18] sm:$0xff]   ;;  %v1663_v4 = vld [vmem:[%s2135_s0] sm:$0xff]   ;;  %v1660_v6 = vld [vmem:[%s2134_s1 + $0x28] sm:$0xff]  }
   0x3   :  { %1560 = vmatpush3.bf16.msra.mxu0 %v1655_v0  ;;  %1647 = vmatpush3.bf16.msra.mxu1 %v1655_v0  ;;  %v1659_v5 = vld [vmem:[%s2134_s1 + $0x20] sm:$0xff]   ;;  %v1661_v7 = vld [vmem:[%s2134_s1 + $0x30] sm:$0xff]   ;;  %v1662_v8 = vld [vmem:[%s2134_s1 + $0x38] sm:$0xff]  }
   0x4   :  { %1561 = vmatprep.subr.bf16.mxu0 %v1656_v1  ;;  %1640 = vmatprep.subr.bf16.mxu1 %v1656_v1  ;;  %v1679_v9 = vld [vmem:[%s2135_s0 + $0x80] sm:$0xff]   ;;  %v1664_v10 = vld [vmem:[%s2135_s0 + $0x8] sm:$0xff]   ;;  %v1665_v11 = vld [vmem:[%s2135_s0 + $0x10] sm:$0xff]  }
   0x5   :  { %1575 = vmatprep.mubr.bf16.mxu0 %v1663_v4  ;;  %1607 = vmatprep.mubr.bf16.mxu1 %v1679_v9  ;;  %v1680_v12 = vld [vmem:[%s2135_s0 + $0x88] sm:$0xff]   ;;  %v1681_v13 = vld [vmem:[%s2135_s0 + $0x90] sm:$0xff]   ;;  %v1666_v14 = vld [vmem:[%s2135_s0 + $0x18] sm:$0xff]  }
   0x6   :  { %v1667_v15 = vld [vmem:[%s2135_s0 + $0x20] sm:$0xff]   ;;  %v1682_v16 = vld [vmem:[%s2135_s0 + $0x98] sm:$0xff]   ;;  %v1668_v18 = vld [vmem:[%s2135_s0 + $0x28] sm:$0xff]  }
   0x7   :  { %1562 = vmatpush3.bf16.msra.mxu0 %v1656_v1  ;;  %1648 = vmatpush3.bf16.msra.mxu1 %v1656_v1  ;;  %v1683_v17 = vld [vmem:[%s2135_s0 + $0xa0] sm:$0xff]   ;;  %v1684_v19 = vld [vmem:[%s2135_s0 + $0xa8] sm:$0xff]   ;;  %v1669_v20 = vld [vmem:[%s2135_s0 + $0x30] sm:$0xff]  }
   0x8   :  { %1563 = vmatprep.subr.bf16.mxu0 %v1657_v2  ;;  %1641 = vmatprep.subr.bf16.mxu1 %v1657_v2  ;;  %v1685_v21 = vld [vmem:[%s2135_s0 + $0xb0] sm:$0xff]   ;;  %v1670_v22 = vld [vmem:[%s2135_s0 + $0x38] sm:$0xff]   ;;  %v1671_v24 = vld [vmem:[%s2135_s0 + $0x40] sm:$0xff]  }
   0x9   :  { %v1686_v23 = vld [vmem:[%s2135_s0 + $0xb8] sm:$0xff]   ;;  %v1687_v25 = vld [vmem:[%s2135_s0 + $0xc0] sm:$0xff]   ;;  %v1672_v26 = vld [vmem:[%s2135_s0 + $0x48] sm:$0xff]  }
   0xa   :  { %v1688_v27 = vld [vmem:[%s2135_s0 + $0xc8] sm:$0xff]   ;;  %v1673_v28 = vld [vmem:[%s2135_s0 + $0x50] sm:$0xff]   ;;  %v1674_v30 = vld [vmem:[%s2135_s0 + $0x58] sm:$0xff]  }
   0xb   :  { %1564 = vmatpush3.bf16.msra.mxu0 %v1657_v2  ;;  %1649 = vmatpush3.bf16.msra.mxu1 %v1657_v2  ;;  %v1689_v29 = vld [vmem:[%s2135_s0 + $0xd0] sm:$0xff]   ;;  %v1690_v31 = vld [vmem:[%s2135_s0 + $0xd8] sm:$0xff]   ;;  %v1675_v32 = vld [vmem:[%s2135_s0 + $0x60] sm:$0xff]  }
   0xc   :  { %1565 = vmatprep.subr.bf16.mxu0 %v1658_v3  ;;  %1642 = vmatprep.subr.bf16.mxu1 %v1658_v3  ;;  %v1691_v33 = vld [vmem:[%s2135_s0 + $0xe0] sm:$0xff]   ;;  %v1676_v34 = vld [vmem:[%s2135_s0 + $0x68] sm:$0xff]   ;;  %v1677_v36 = vld [vmem:[%s2135_s0 + $0x70] sm:$0xff]  }
   0xd   :  { %v1692_v35 = vld [vmem:[%s2135_s0 + $0xe8] sm:$0xff]   ;;  %v1693_v37 = vld [vmem:[%s2135_s0 + $0xf0] sm:$0xff]   ;;  %v1678_v38 = vld [vmem:[%s2135_s0 + $0x78] sm:$0xff]  }
   0xe   :  { %v1694_v39 = vld [vmem:[%s2135_s0 + $0xf8] sm:$0xff]  }
   0xf   :  { %1566 = vmatpush3.bf16.msra.mxu0 %v1658_v3  ;;  %1650 = vmatpush3.bf16.msra.mxu1 %v1658_v3 }
  0x10   :  { %1567 = vmatprep.subr.bf16.mxu0 %v1659_v5  ;;  %1643 = vmatprep.subr.bf16.mxu1 %v1659_v5 }
  0x13   :  { %1568 = vmatpush3.bf16.msra.mxu0 %v1659_v5  ;;  %1651 = vmatpush3.bf16.msra.mxu1 %v1659_v5 }
  0x14   :  { %1569 = vmatprep.subr.bf16.mxu0 %v1660_v6  ;;  %1644 = vmatprep.subr.bf16.mxu1 %v1660_v6 }
  0x17   :  { %1570 = vmatpush3.bf16.msra.mxu0 %v1660_v6  ;;  %1652 = vmatpush3.bf16.msra.mxu1 %v1660_v6 }
  0x18   :  { %1571 = vmatprep.subr.bf16.mxu0 %v1661_v7  ;;  %1645 = vmatprep.subr.bf16.mxu1 %v1661_v7 }
  0x1b   :  { %1572 = vmatpush3.bf16.msra.mxu0 %v1661_v7  ;;  %1653 = vmatpush3.bf16.msra.mxu1 %v1661_v7 }
  0x1c   :  { %1573 = vmatprep.subr.bf16.mxu0 %v1662_v8  ;;  %1646 = vmatprep.subr.bf16.mxu1 %v1662_v8 }
  0x1f   :  { %1574 = vmatpush3.bf16.msra.mxu0 %v1662_v8  ;;  %1654 = vmatpush3.bf16.msra.mxu1 %v1662_v8 }
  0x22   :  { %1576 = vmatmul.mubr.bf16.vlgmr.msra.gmra.mrb[0].mxu0 %v1664_v10  ;;  %1608 = vmatmul.mubr.bf16.vlgmr.msra.gmra.mrb[0].mxu1 %v1680_v12 }
  0x23   :  { %1579 = vmatprep.mubr.bf16.mxu0 %v1665_v11  ;;  %1611 = vmatprep.mubr.bf16.mxu1 %v1681_v13 }
  0x2a   :  { %1580 = vmatmul.mubr.bf16.gmra.mrb[4].mxu0 %v1666_v14  ;;  %1612 = vmatmul.mubr.bf16.gmra.mrb[4].mxu1 %v1682_v16 }
  0x2b   :  { %1583 = vmatprep.mubr.bf16.mxu0 %v1667_v15  ;;  %1615 = vmatprep.mubr.bf16.mxu1 %v1683_v17 }
  0x32   :  { %1584 = vmatmul.mubr.bf16.gmra.mrb[8].mxu0 %v1668_v18  ;;  %1616 = vmatmul.mubr.bf16.gmra.mrb[8].mxu1 %v1684_v19 }
  0x33   :  { %1587 = vmatprep.mubr.bf16.mxu0 %v1669_v20  ;;  %1619 = vmatprep.mubr.bf16.mxu1 %v1685_v21 }
  0x3a   :  { %1588 = vmatmul.mubr.bf16.gmra.mrb[12].mxu0 %v1670_v22  ;;  %1620 = vmatmul.mubr.bf16.gmra.mrb[12].mxu1 %v1686_v23 }
  0x3b   :  { %1591 = vmatprep.mubr.bf16.mxu0 %v1671_v24  ;;  %1623 = vmatprep.mubr.bf16.mxu1 %v1687_v25 }
  0x42   :  { %1592 = vmatmul.mubr.bf16.gmra.mrb[16].mxu0 %v1672_v26  ;;  %1624 = vmatmul.mubr.bf16.gmra.mrb[16].mxu1 %v1688_v27 }
  0x43   :  { %1595 = vmatprep.mubr.bf16.mxu0 %v1673_v28  ;;  %1627 = vmatprep.mubr.bf16.mxu1 %v1689_v29 }
  0x4a   :  { %1596 = vmatmul.mubr.bf16.gmra.mrb[20].mxu0 %v1674_v30  ;;  %1628 = vmatmul.mubr.bf16.gmra.mrb[20].mxu1 %v1690_v31 }
  0x4b   :  { %1599 = vmatprep.mubr.bf16.mxu0 %v1675_v32  ;;  %1631 = vmatprep.mubr.bf16.mxu1 %v1691_v33 }
  0x52   :  { %1600 = vmatmul.mubr.bf16.gmra.mrb[24].mxu0 %v1676_v34  ;;  %1632 = vmatmul.mubr.bf16.gmra.mrb[24].mxu1 %v1692_v35 }
  0x53   :  { %1603 = vmatprep.mubr.bf16.mxu0 %v1677_v36  ;;  %1635 = vmatprep.mubr.bf16.mxu1 %v1693_v37 }
  0x5a   :  { %1604 = vmatmul.mubr.bf16.gmra.mrb[28].mxu0 %v1678_v38  ;;  %1636 = vmatmul.mubr.bf16.gmra.mrb[28].mxu1 %v1694_v39 }
  0xf5   :  { %v1577_v40 = vpop.f32.mrb[0].mxu0  ;;  %v1840_v41 = vpop.f32.mrb[0].mxu1 }
  0xf6   :  { %v369_v42 = vpop.f32.mrb[1].mxu0  ;;  %v1842_v43 = vpop.f32.mrb[1].mxu1  ;;  %v1016_v55 = vmul.f32 %v1577_v40, %v1577_v40 }
  0xf7   :  { %v1578_v44 = vpop.f32.mrb[2].mxu0  ;;  %v1844_v45 = vpop.f32.mrb[2].mxu1  ;;  %v1014_v46 = vmul.f32 %v369_v42, %v369_v42 }
  0xf8   :  { %v1336_v47 = vpack.c.bf16 %v1578_v44, %v1577_v40  ;;  %v372_v48 = vpop.f32.mrb[3].mxu0  ;;  %v1416_v49 = vpack.c.bf16 %v1844_v45, %v1840_v41  ;;  %v1848_v50 = vpop.f32.mrb[3].mxu1  ;;  %v1017_v58 = vmul.f32 %v1578_v44, %v1578_v44 }
  0xf9   :  { %v1331_v51 = vpack.c.bf16 %v372_v48, %v369_v42  ;;  %v944_v52 = vadd.f32 %v372_v48, %v369_v42  ;;  %v1015_v53 = vmul.f32 %v372_v48, %v372_v48  ;;  %v1411_v54 = vpack.c.bf16 %v1848_v50, %v1842_v43 }
  0xfa   :  { %1488 = vst [vmem:[%s2136_s2 + $0x8] sm:$0xff] %v1336_v47   ;;  %1504 = vst [vmem:[%s2136_s2 + $0x88] sm:$0xff] %v1416_v49  }
  0xfb   :  { %1332 = vst [vmem:[%s2136_s2] sm:$0xff] %v1331_v51   ;;  %v945_v56 = vadd.f32 %v1577_v40, %v944_v52  ;;  %v1078_v57 = vadd.f32 %v1015_v53, %v1014_v46  ;;  %1503 = vst [vmem:[%s2136_s2 + $0x80] sm:$0xff] %v1411_v54  }
  0xfd   :  { %v1079_v59 = vadd.f32 %v1078_v57, %v1016_v55  ;;  %v1581_v60 = vpop.f32.mrb[4].mxu0  ;;  %v946_v61 = vadd.f32 %v1578_v44, %v945_v56  ;;  %v1864_v62 = vpop.f32.mrb[4].mxu1 }
  0xfe   :  { %v385_v63 = vpop.f32.mrb[5].mxu0  ;;  %v1866_v0 = vpop.f32.mrb[5].mxu1  ;;  %v1020_v15 = vmul.f32 %v1581_v60, %v1581_v60 }
  0xff   :  { %v947_v1 = vadd.f32 %v946_v61, %v385_v63  ;;  %v1018_v2 = vmul.f32 %v385_v63, %v385_v63  ;;  %v1080_v3 = vadd.f32 %v1079_v59, %v1017_v58  ;;  %v1582_v4 = vpop.f32.mrb[6].mxu0  ;;  %v1868_v5 = vpop.f32.mrb[6].mxu1 }
 0x100   :  { %v1346_v6 = vpack.c.bf16 %v1582_v4, %v1581_v60  ;;  %v388_v7 = vpop.f32.mrb[7].mxu0  ;;  %v1426_v8 = vpack.c.bf16 %v1868_v5, %v1864_v62  ;;  %v1872_v9 = vpop.f32.mrb[7].mxu1  ;;  %v1021_v18 = vmul.f32 %v1582_v4, %v1582_v4 }
 0x101   :  { %v1081_v10 = vadd.f32 %v1080_v3, %v1018_v2  ;;  %v1341_v11 = vpack.c.bf16 %v388_v7, %v385_v63  ;;  %v948_v12 = vadd.f32 %v947_v1, %v388_v7  ;;  %v1019_v13 = vmul.f32 %v388_v7, %v388_v7 }
 0x102   :  { %1490 = vst [vmem:[%s2136_s2 + $0x18] sm:$0xff] %v1346_v6   ;;  %1506 = vst [vmem:[%s2136_s2 + $0x98] sm:$0xff] %v1426_v8   ;;  %v1421_v14 = vpack.c.bf16 %v1872_v9, %v1866_v0 }
 0x103   :  { %1489 = vst [vmem:[%s2136_s2 + $0x10] sm:$0xff] %v1341_v11   ;;  %v949_v16 = vadd.f32 %v1581_v60, %v948_v12  ;;  %v1082_v17 = vadd.f32 %v1081_v10, %v1019_v13 }
 0x104   :  { %1505 = vst [vmem:[%s2136_s2 + $0x90] sm:$0xff] %v1421_v14  }
 0x105   :  { %v1083_v19 = vadd.f32 %v1082_v17, %v1020_v15  ;;  %v1585_v20 = vpop.f32.mrb[8].mxu0  ;;  %v950_v21 = vadd.f32 %v1582_v4, %v949_v16  ;;  %v1888_v22 = vpop.f32.mrb[8].mxu1 }
 0x106   :  { %v401_v23 = vpop.f32.mrb[9].mxu0  ;;  %v1890_v24 = vpop.f32.mrb[9].mxu1  ;;  %v1024_v39 = vmul.f32 %v1585_v20, %v1585_v20 }
 0x107   :  { %v951_v25 = vadd.f32 %v950_v21, %v401_v23  ;;  %v1022_v26 = vmul.f32 %v401_v23, %v401_v23  ;;  %v1084_v27 = vadd.f32 %v1083_v19, %v1021_v18  ;;  %v1586_v28 = vpop.f32.mrb[10].mxu0  ;;  %v1892_v29 = vpop.f32.mrb[10].mxu1 }
 0x108   :  { %v1356_v30 = vpack.c.bf16 %v1586_v28, %v1585_v20  ;;  %v404_v31 = vpop.f32.mrb[11].mxu0  ;;  %v1436_v32 = vpack.c.bf16 %v1892_v29, %v1888_v22  ;;  %v1896_v33 = vpop.f32.mrb[11].mxu1  ;;  %v1025_v44 = vmul.f32 %v1586_v28, %v1586_v28 }
 0x109   :  { %v1085_v34 = vadd.f32 %v1084_v27, %v1022_v26  ;;  %v1351_v35 = vpack.c.bf16 %v404_v31, %v401_v23  ;;  %v952_v36 = vadd.f32 %v951_v25, %v404_v31  ;;  %v1023_v37 = vmul.f32 %v404_v31, %v404_v31 }
 0x10a   :  { %1492 = vst [vmem:[%s2136_s2 + $0x28] sm:$0xff] %v1356_v30   ;;  %1508 = vst [vmem:[%s2136_s2 + $0xa8] sm:$0xff] %v1436_v32   ;;  %v1431_v38 = vpack.c.bf16 %v1896_v33, %v1890_v24 }
 0x10b   :  { %1491 = vst [vmem:[%s2136_s2 + $0x20] sm:$0xff] %v1351_v35   ;;  %v953_v40 = vadd.f32 %v1585_v20, %v952_v36  ;;  %v1086_v42 = vadd.f32 %v1085_v34, %v1023_v37 }
 0x10c   :  { %1507 = vst [vmem:[%s2136_s2 + $0xa0] sm:$0xff] %v1431_v38  }
 0x10d   :  { %v1087_v46 = vadd.f32 %v1086_v42, %v1024_v39  ;;  %v1589_v47 = vpop.f32.mrb[12].mxu0  ;;  %v954_v48 = vadd.f32 %v1586_v28, %v953_v40  ;;  %v1912_v49 = vpop.f32.mrb[12].mxu1 }
 0x10e   :  { %v417_v51 = vpop.f32.mrb[13].mxu0  ;;  %v1914_v52 = vpop.f32.mrb[13].mxu1  ;;  %v1028_v6 = vmul.f32 %v1589_v47, %v1589_v47 }
 0x10f   :  { %v955_v53 = vadd.f32 %v954_v48, %v417_v51  ;;  %v1026_v54 = vmul.f32 %v417_v51, %v417_v51  ;;  %v1088_v55 = vadd.f32 %v1087_v46, %v1025_v44  ;;  %v1590_v56 = vpop.f32.mrb[14].mxu0  ;;  %v1916_v57 = vpop.f32.mrb[14].mxu1 }
 0x110   :  { %v1366_v58 = vpack.c.bf16 %v1590_v56, %v1589_v47  ;;  %v420_v59 = vpop.f32.mrb[15].mxu0  ;;  %v1446_v60 = vpack.c.bf16 %v1916_v57, %v1912_v49  ;;  %v1920_v61 = vpop.f32.mrb[15].mxu1  ;;  %v1029_v10 = vmul.f32 %v1590_v56, %v1590_v56 }
 0x111   :  { %v1089_v63 = vadd.f32 %v1088_v55, %v1026_v54  ;;  %v1361_v1 = vpack.c.bf16 %v420_v59, %v417_v51  ;;  %v956_v2 = vadd.f32 %v955_v53, %v420_v59  ;;  %v1027_v3 = vmul.f32 %v420_v59, %v420_v59 }
 0x112   :  { %1494 = vst [vmem:[%s2136_s2 + $0x38] sm:$0xff] %v1366_v58   ;;  %1510 = vst [vmem:[%s2136_s2 + $0xb8] sm:$0xff] %v1446_v60   ;;  %v1441_v4 = vpack.c.bf16 %v1920_v61, %v1914_v52 }
 0x113   :  { %1493 = vst [vmem:[%s2136_s2 + $0x30] sm:$0xff] %v1361_v1   ;;  %v957_v7 = vadd.f32 %v1589_v47, %v956_v2  ;;  %v1090_v8 = vadd.f32 %v1089_v63, %v1027_v3 }
 0x114   :  { %1509 = vst [vmem:[%s2136_s2 + $0xb0] sm:$0xff] %v1441_v4  }
 0x115   :  { %v1091_v11 = vadd.f32 %v1090_v8, %v1028_v6  ;;  %v1593_v12 = vpop.f32.mrb[16].mxu0  ;;  %v958_v13 = vadd.f32 %v1590_v56, %v957_v7  ;;  %v1936_v14 = vpop.f32.mrb[16].mxu1 }
 0x116   :  { %v433_v15 = vpop.f32.mrb[17].mxu0  ;;  %v1938_v16 = vpop.f32.mrb[17].mxu1  ;;  %v1032_v35 = vmul.f32 %v1593_v12, %v1593_v12 }
 0x117   :  { %v959_v17 = vadd.f32 %v958_v13, %v433_v15  ;;  %v1030_v18 = vmul.f32 %v433_v15, %v433_v15  ;;  %v1092_v19 = vadd.f32 %v1091_v11, %v1029_v10  ;;  %v1594_v20 = vpop.f32.mrb[18].mxu0  ;;  %v1940_v21 = vpop.f32.mrb[18].mxu1 }
 0x118   :  { %v1376_v23 = vpack.c.bf16 %v1594_v20, %v1593_v12  ;;  %v436_v25 = vpop.f32.mrb[19].mxu0  ;;  %v1456_v26 = vpack.c.bf16 %v1940_v21, %v1936_v14  ;;  %v1944_v27 = vpop.f32.mrb[19].mxu1  ;;  %v1033_v38 = vmul.f32 %v1594_v20, %v1594_v20 }
 0x119   :  { %v1093_v28 = vadd.f32 %v1092_v19, %v1030_v18  ;;  %v1371_v30 = vpack.c.bf16 %v436_v25, %v433_v15  ;;  %v960_v31 = vadd.f32 %v959_v17, %v436_v25  ;;  %v1031_v32 = vmul.f32 %v436_v25, %v436_v25 }
 0x11a   :  { %1496 = vst [vmem:[%s2136_s2 + $0x48] sm:$0xff] %v1376_v23   ;;  %1512 = vst [vmem:[%s2136_s2 + $0xc8] sm:$0xff] %v1456_v26   ;;  %v1451_v34 = vpack.c.bf16 %v1944_v27, %v1938_v16 }
 0x11b   :  { %1495 = vst [vmem:[%s2136_s2 + $0x40] sm:$0xff] %v1371_v30   ;;  %v961_v36 = vadd.f32 %v1593_v12, %v960_v31  ;;  %v1094_v37 = vadd.f32 %v1093_v28, %v1031_v32 }
 0x11c   :  { %1511 = vst [vmem:[%s2136_s2 + $0xc0] sm:$0xff] %v1451_v34  }
 0x11d   :  { %v1095_v39 = vadd.f32 %v1094_v37, %v1032_v35  ;;  %v1597_v40 = vpop.f32.mrb[20].mxu0  ;;  %v962_v42 = vadd.f32 %v1594_v20, %v961_v36  ;;  %v1960_v44 = vpop.f32.mrb[20].mxu1 }
 0x11e   :  { %v449_v46 = vpop.f32.mrb[21].mxu0  ;;  %v1962_v47 = vpop.f32.mrb[21].mxu1  ;;  %v1036_v6 = vmul.f32 %v1597_v40, %v1597_v40 }
 0x11f   :  { %v963_v48 = vadd.f32 %v962_v42, %v449_v46  ;;  %v1034_v51 = vmul.f32 %v449_v46, %v449_v46  ;;  %v1096_v53 = vadd.f32 %v1095_v39, %v1033_v38  ;;  %v1598_v54 = vpop.f32.mrb[22].mxu0  ;;  %v1964_v55 = vpop.f32.mrb[22].mxu1 }
 0x120   :  { %v1386_v56 = vpack.c.bf16 %v1598_v54, %v1597_v40  ;;  %v452_v58 = vpop.f32.mrb[23].mxu0  ;;  %v1466_v59 = vpack.c.bf16 %v1964_v55, %v1960_v44  ;;  %v1968_v60 = vpop.f32.mrb[23].mxu1  ;;  %v1037_v10 = vmul.f32 %v1598_v54, %v1598_v54 }
 0x121   :  { %v1097_v63 = vadd.f32 %v1096_v53, %v1034_v51  ;;  %v1381_v1 = vpack.c.bf16 %v452_v58, %v449_v46  ;;  %v964_v2 = vadd.f32 %v963_v48, %v452_v58  ;;  %v1035_v3 = vmul.f32 %v452_v58, %v452_v58 }
 0x122   :  { %1498 = vst [vmem:[%s2136_s2 + $0x58] sm:$0xff] %v1386_v56   ;;  %1514 = vst [vmem:[%s2136_s2 + $0xd8] sm:$0xff] %v1466_v59   ;;  %v1461_v4 = vpack.c.bf16 %v1968_v60, %v1962_v47 }
 0x123   :  { %1497 = vst [vmem:[%s2136_s2 + $0x50] sm:$0xff] %v1381_v1   ;;  %v965_v7 = vadd.f32 %v1597_v40, %v964_v2  ;;  %v1098_v8 = vadd.f32 %v1097_v63, %v1035_v3 }
 0x124   :  { %1513 = vst [vmem:[%s2136_s2 + $0xd0] sm:$0xff] %v1461_v4  }
 0x125   :  { %v1099_v11 = vadd.f32 %v1098_v8, %v1036_v6  ;;  %v1601_v12 = vpop.f32.mrb[24].mxu0  ;;  %v966_v13 = vadd.f32 %v1598_v54, %v965_v7  ;;  %v1984_v15 = vpop.f32.mrb[24].mxu1 }
 0x126   :  { %v465_v17 = vpop.f32.mrb[25].mxu0  ;;  %v1986_v18 = vpop.f32.mrb[25].mxu1  ;;  %v1040_v39 = vmul.f32 %v1601_v12, %v1601_v12 }
 0x127   :  { %v967_v19 = vadd.f32 %v966_v13, %v465_v17  ;;  %v1038_v20 = vmul.f32 %v465_v17, %v465_v17  ;;  %v1100_v23 = vadd.f32 %v1099_v11, %v1037_v10  ;;  %v1602_v25 = vpop.f32.mrb[26].mxu0  ;;  %v1988_v26 = vpop.f32.mrb[26].mxu1 }
 0x128   :  { %v1396_v28 = vpack.c.bf16 %v1602_v25, %v1601_v12  ;;  %v468_v30 = vpop.f32.mrb[27].mxu0  ;;  %v1476_v31 = vpack.c.bf16 %v1988_v26, %v1984_v15  ;;  %v1992_v32 = vpop.f32.mrb[27].mxu1  ;;  %v1041_v46 = vmul.f32 %v1602_v25, %v1602_v25 }
 0x129   :  { %v1101_v34 = vadd.f32 %v1100_v23, %v1038_v20  ;;  %v1391_v35 = vpack.c.bf16 %v468_v30, %v465_v17  ;;  %v968_v36 = vadd.f32 %v967_v19, %v468_v30  ;;  %v1039_v37 = vmul.f32 %v468_v30, %v468_v30 }
 0x12a   :  { %1500 = vst [vmem:[%s2136_s2 + $0x68] sm:$0xff] %v1396_v28   ;;  %1516 = vst [vmem:[%s2136_s2 + $0xe8] sm:$0xff] %v1476_v31   ;;  %v1471_v38 = vpack.c.bf16 %v1992_v32, %v1986_v18  ;;  %v1046_v31 = vmul.f32 %v1842_v43, %v1842_v43 }
 0x12b   :  { %1499 = vst [vmem:[%s2136_s2 + $0x60] sm:$0xff] %v1391_v35   ;;  %v969_v40 = vadd.f32 %v1601_v12, %v968_v36  ;;  %v1102_v42 = vadd.f32 %v1101_v34, %v1039_v37 }
 0x12c   :  { %1515 = vst [vmem:[%s2136_s2 + $0xe0] sm:$0xff] %v1471_v38   ;;  %v1047_v38 = vmul.f32 %v1848_v50, %v1848_v50 }
 0x12d   :  { %v1103_v48 = vadd.f32 %v1102_v42, %v1040_v39  ;;  %v1605_v51 = vpop.f32.mrb[28].mxu0  ;;  %v970_v53 = vadd.f32 %v1602_v25, %v969_v40  ;;  %v2008_v54 = vpop.f32.mrb[28].mxu1  ;;  %v1048_v39 = vmul.f32 %v1840_v41, %v1840_v41 }
 0x12e   :  { %v481_v56 = vpop.f32.mrb[29].mxu0  ;;  %v2010_v58 = vpop.f32.mrb[29].mxu1  ;;  %v1044_v19 = vmul.f32 %v1605_v51, %v1605_v51 }
 0x12f   :  { %v971_v59 = vadd.f32 %v970_v53, %v481_v56  ;;  %v1042_v63 = vmul.f32 %v481_v56, %v481_v56  ;;  %v1104_v1 = vadd.f32 %v1103_v48, %v1041_v46  ;;  %v1606_v2 = vpop.f32.mrb[30].mxu0  ;;  %v2012_v3 = vpop.f32.mrb[30].mxu1  ;;  %v1049_v46 = vmul.f32 %v1844_v45, %v1844_v45 }
 0x130   :  { %v1406_v4 = vpack.c.bf16 %v1606_v2, %v1605_v51  ;;  %v484_v6 = vpop.f32.mrb[31].mxu0  ;;  %v1486_v7 = vpack.c.bf16 %v2012_v3, %v2008_v54  ;;  %v2016_v8 = vpop.f32.mrb[31].mxu1  ;;  %v1045_v25 = vmul.f32 %v1606_v2, %v1606_v2 }
 0x131   :  { %v1105_v10 = vadd.f32 %v1104_v1, %v1042_v63  ;;  %v1401_v11 = vpack.c.bf16 %v484_v6, %v481_v56  ;;  %v972_v12 = vadd.f32 %v971_v59, %v484_v6  ;;  %v1043_v13 = vmul.f32 %v484_v6, %v484_v6 }
 0x132   :  { %1502 = vst [vmem:[%s2136_s2 + $0x78] sm:$0xff] %v1406_v4   ;;  %1518 = vst [vmem:[%s2136_s2 + $0xf8] sm:$0xff] %v1486_v7   ;;  %v1481_v17 = vpack.c.bf16 %v2016_v8, %v2010_v58  ;;  %v1051_v63 = vmul.f32 %v1872_v9, %v1872_v9 }
 0x133   :  { %1501 = vst [vmem:[%s2136_s2 + $0x70] sm:$0xff] %v1401_v11   ;;  %v973_v20 = vadd.f32 %v1605_v51, %v972_v12  ;;  %v1106_v23 = vadd.f32 %v1105_v10, %v1043_v13  ;;  %v1055_v12 = vmul.f32 %v1896_v33, %v1896_v33 }
 0x134   :  { %1517 = vst [vmem:[%s2136_s2 + $0xf0] sm:$0xff] %v1481_v17  }
 0x135   :  { %v1107_v28 = vadd.f32 %v1106_v23, %v1044_v19  ;;  %v974_v30 = vadd.f32 %v1606_v2, %v973_v20 }
 0x137   :  { %v975_v34 = vadd.f32 %v974_v30, %v1842_v43  ;;  %v1108_v35 = vadd.f32 %v1107_v28, %v1045_v25  ;;  %v1050_v43 = vmul.f32 %v1866_v0, %v1866_v0  ;;  %v1059_v30 = vmul.f32 %v1920_v61, %v1920_v61 }
 0x139   :  { %v1109_v36 = vadd.f32 %v1108_v35, %v1046_v31  ;;  %v976_v37 = vadd.f32 %v975_v34, %v1848_v50 }
 0x13b   :  { %v977_v40 = vadd.f32 %v1840_v41, %v976_v37  ;;  %v1110_v42 = vadd.f32 %v1109_v36, %v1047_v38  ;;  %v1052_v41 = vmul.f32 %v1864_v62, %v1864_v62 }
 0x13d   :  { %v1111_v48 = vadd.f32 %v1110_v42, %v1048_v39  ;;  %v978_v51 = vadd.f32 %v1844_v45, %v977_v40  ;;  %v1053_v45 = vmul.f32 %v1868_v5, %v1868_v5  ;;  %v1063_v40 = vmul.f32 %v1944_v27, %v1944_v27 }
 0x13f   :  { %v979_v53 = vadd.f32 %v978_v51, %v1866_v0  ;;  %v1112_v56 = vadd.f32 %v1111_v48, %v1049_v46  ;;  %v1054_v0 = vmul.f32 %v1890_v24, %v1890_v24 }
 0x141   :  { %v1113_v59 = vadd.f32 %v1112_v56, %v1050_v43  ;;  %v980_v50 = vadd.f32 %v979_v53, %v1872_v9 }
 0x143   :  { %v981_v1 = vadd.f32 %v1864_v62, %v980_v50  ;;  %v1114_v2 = vadd.f32 %v1113_v59, %v1051_v63  ;;  %v1056_v62 = vmul.f32 %v1888_v22, %v1888_v22  ;;  %v1067_v59 = vmul.f32 %v1968_v60, %v1968_v60 }
 0x145   :  { %v1115_v4 = vadd.f32 %v1114_v2, %v1052_v41  ;;  %v982_v6 = vadd.f32 %v1868_v5, %v981_v1  ;;  %v1057_v5 = vmul.f32 %v1892_v29, %v1892_v29 }
 0x147   :  { %v983_v7 = vadd.f32 %v982_v6, %v1890_v24  ;;  %v1116_v10 = vadd.f32 %v1115_v4, %v1053_v45  ;;  %v1058_v24 = vmul.f32 %v1914_v52, %v1914_v52  ;;  %v1071_v6 = vmul.f32 %v1992_v32, %v1992_v32 }
 0x149   :  { %v1117_v11 = vadd.f32 %v1116_v10, %v1054_v0  ;;  %v984_v9 = vadd.f32 %v983_v7, %v1896_v33 }
 0x14b   :  { %v985_v13 = vadd.f32 %v1888_v22, %v984_v9  ;;  %v1118_v17 = vadd.f32 %v1117_v11, %v1055_v12  ;;  %v1060_v22 = vmul.f32 %v1912_v49, %v1912_v49 }
 0x14d   :  { %v1119_v19 = vadd.f32 %v1118_v17, %v1056_v62  ;;  %v986_v20 = vadd.f32 %v1892_v29, %v985_v13  ;;  %v1061_v29 = vmul.f32 %v1916_v57, %v1916_v57  ;;  %v1075_v13 = vmul.f32 %v2016_v8, %v2016_v8 }
 0x14f   :  { %v987_v23 = vadd.f32 %v986_v20, %v1914_v52  ;;  %v1120_v25 = vadd.f32 %v1119_v19, %v1057_v5  ;;  %v1062_v52 = vmul.f32 %v1938_v16, %v1938_v16 }
 0x151   :  { %v1121_v28 = vadd.f32 %v1120_v25, %v1058_v24  ;;  %v988_v33 = vadd.f32 %v987_v23, %v1920_v61 }
 0x153   :  { %v989_v31 = vadd.f32 %v1912_v49, %v988_v33  ;;  %v1122_v34 = vadd.f32 %v1121_v28, %v1059_v30  ;;  %v1064_v49 = vmul.f32 %v1936_v14, %v1936_v14 }
 0x155   :  { %v1123_v35 = vadd.f32 %v1122_v34, %v1060_v22  ;;  %v990_v36 = vadd.f32 %v1916_v57, %v989_v31  ;;  %v1065_v57 = vmul.f32 %v1940_v21, %v1940_v21 }
 0x157   :  { %v991_v37 = vadd.f32 %v990_v36, %v1938_v16  ;;  %v1124_v38 = vadd.f32 %v1123_v35, %v1061_v29  ;;  %v1066_v16 = vmul.f32 %v1962_v47, %v1962_v47 }
 0x159   :  { %v1125_v39 = vadd.f32 %v1124_v38, %v1062_v52  ;;  %v992_v61 = vadd.f32 %v991_v37, %v1944_v27 }
 0x15b   :  { %v993_v42 = vadd.f32 %v1936_v14, %v992_v61  ;;  %v1126_v46 = vadd.f32 %v1125_v39, %v1063_v40  ;;  %v1068_v14 = vmul.f32 %v1960_v44, %v1960_v44 }
 0x15d   :  { %v1127_v48 = vadd.f32 %v1126_v46, %v1064_v49  ;;  %v994_v51 = vadd.f32 %v1940_v21, %v993_v42  ;;  %v1069_v21 = vmul.f32 %v1964_v55, %v1964_v55 }
 0x15f   :  { %v995_v43 = vadd.f32 %v994_v51, %v1962_v47  ;;  %v1128_v53 = vadd.f32 %v1127_v48, %v1065_v57  ;;  %v1070_v47 = vmul.f32 %v1986_v18, %v1986_v18 }
 0x161   :  { %v1129_v56 = vadd.f32 %v1128_v53, %v1066_v16  ;;  %v996_v27 = vadd.f32 %v995_v43, %v1968_v60 }
 0x163   :  { %v997_v50 = vadd.f32 %v1960_v44, %v996_v27  ;;  %v1130_v63 = vadd.f32 %v1129_v56, %v1067_v59  ;;  %v1072_v44 = vmul.f32 %v1984_v15, %v1984_v15 }
 0x165   :  { %v1131_v41 = vadd.f32 %v1130_v63, %v1068_v14  ;;  %v998_v1 = vadd.f32 %v1964_v55, %v997_v50  ;;  %v1073_v55 = vmul.f32 %v1988_v26, %v1988_v26 }
 0x167   :  { %v999_v2 = vadd.f32 %v998_v1, %v1986_v18  ;;  %v1132_v45 = vadd.f32 %v1131_v41, %v1069_v21  ;;  %v1074_v18 = vmul.f32 %v2010_v58, %v2010_v58 }
 0x169   :  { %v1133_v4 = vadd.f32 %v1132_v45, %v1070_v47  ;;  %v1000_v60 = vadd.f32 %v999_v2, %v1992_v32 }
 0x16b   :  { %v1001_v0 = vadd.f32 %v1984_v15, %v1000_v60  ;;  %v1134_v7 = vadd.f32 %v1133_v4, %v1071_v6  ;;  %v1076_v15 = vmul.f32 %v2008_v54, %v2008_v54 }
 0x16d   :  { %v1135_v10 = vadd.f32 %v1134_v7, %v1072_v44  ;;  %v1002_v11 = vadd.f32 %v1988_v26, %v1001_v0  ;;  %v1077_v26 = vmul.f32 %v2012_v3, %v2012_v3 }
 0x16f   :  { %v1003_v9 = vadd.f32 %v1002_v11, %v2010_v58  ;;  %v1136_v12 = vadd.f32 %v1135_v10, %v1073_v55 }
 0x171   :  { %v1137_v62 = vadd.f32 %v1136_v12, %v1074_v18  ;;  %v1004_v32 = vadd.f32 %v1003_v9, %v2016_v8 }
 0x173   :  { %v1005_v17 = vadd.f32 %v2008_v54, %v1004_v32  ;;  %v1138_v5 = vadd.f32 %v1137_v62, %v1075_v13 }
 0x175   :  { %v1006_v19 = vadd.f32 %v2012_v3, %v1005_v17  ;;  %v1139_v20 = vadd.f32 %v1138_v5, %v1076_v15 }
 0x177   :  { %v1007_v58 = vrot.slane %v1006_v19, 4  ;;  %v1140_v24 = vadd.f32 %v1139_v20, %v1077_v26 }
 0x179   :  { %v1008_v23 = vadd.f32 %v1007_v58, %v1006_v19  ;;  %v1141_v25 = vrot.slane %v1140_v24, 4 }
 0x17b   :  { %v1009_v28 = vrot.slane %v1008_v23, 2  ;;  %v1142_v33 = vadd.f32 %v1141_v25, %v1140_v24 }
 0x17d   :  { %v1010_v30 = vadd.f32 %v1009_v28, %v1008_v23  ;;  %v1143_v8 = vrot.slane %v1142_v33, 2 }
 0x17f   :  { %v1011_v22 = vrot.slane %v1010_v30, 1  ;;  %v1144_v31 = vadd.f32 %v1143_v8, %v1142_v33 }
 0x181   :  { %v1012_v34 = vadd.f32 %v1011_v22, %v1010_v30  ;;  %v1145_v29 = vrot.slane %v1144_v31, 1 }
 0x183   :  { %1013 = vst [vmem:[%s2137_s3] sm:$0x1] %v1012_v34  ;;  %v1146_v54 = vadd.f32 %v1145_v29, %v1144_v31 }
 0x185   :  { %1147 = vst [vmem:[%s2138_s4] sm:$0x1] %v1146_v54 }

// kernel: inception_module.3
= control target key start
LH: loop header
LB: loop body
LE: loop exit
PB: predicated region body
PF: predicated region fallthrough
CT: control target
= control target key end

     0   :  { %s1023_s0 = inlined_call_operand.vmem [shape: bf16[512,128], index: 0, kind: input, shape index: {}]   ;;  %s1024_s1 = inlined_call_operand.vmem [shape: f32[1,128], index: 1, kind: input, shape index: {}]   ;;  %s1025_s2 = inlined_call_operand.vmem [shape: f32[1,128], index: 2, kind: input, shape index: {}]   ;;  %s1026_s3 = inlined_call_operand.vmem [shape: f32[512,128], index: 3, kind: output, shape index: {}]  }
   0x1   :  { %v419_v0 = vld [vmem:[%s1023_s0] sm:$0xff]   ;;  %v546_v4 = vld [vmem:[%s1023_s0 + $0x8] sm:$0xff]   ;;  %v547_v5 = vld [vmem:[%s1023_s0 + $0x10] sm:$0xff]  }
   0x2   :  { %v603_v1 = vld [vmem:[%s1024_s1] ss:$0 sm:$0xff]  ;;  %v420_v2 = vunpack.c.l.bf16 %v419_v0  ;;  %v421_v3 = vunpack.c.h.bf16 %v419_v0  ;;  %v548_v6 = vld [vmem:[%s1023_s0 + $0x18] sm:$0xff]   ;;  %v424_v8 = vunpack.c.l.bf16 %v546_v4  ;;  %v425_v9 = vunpack.c.h.bf16 %v546_v4  ;;  %v550_v33 = vld [vmem:[%s1023_s0 + $0x28] sm:$0xff]  }
   0x3   :  { %v617_v7 = vld [vmem:[%s1025_s2] ss:$0 sm:$0xff]  ;;  %v428_v10 = vunpack.c.l.bf16 %v547_v5  ;;  %v429_v11 = vunpack.c.h.bf16 %v547_v5  ;;  %v432_v14 = vunpack.c.l.bf16 %v548_v6  ;;  %v433_v15 = vunpack.c.h.bf16 %v548_v6  ;;  %v551_v34 = vld [vmem:[%s1023_s0 + $0x30] sm:$0xff]   ;;  %v552_v39 = vld [vmem:[%s1023_s0 + $0x38] sm:$0xff]  }
   0x4   :  { %v149_v12 = vmul.f32 %v420_v2, %v603_v1  ;;  %v150_v13 = vmul.f32 %v421_v3, %v603_v1  ;;  %v151_v16 = vmul.f32 %v424_v8, %v603_v1  ;;  %v152_v17 = vmul.f32 %v425_v9, %v603_v1  ;;  %v549_v28 = vld [vmem:[%s1023_s0 + $0x20] sm:$0xff]   ;;  %v554_v6 = vld [vmem:[%s1023_s0 + $0x48] sm:$0xff]   ;;  %v555_v8 = vld [vmem:[%s1023_s0 + $0x50] sm:$0xff]  }
   0x5   :  { %v153_v18 = vmul.f32 %v428_v10, %v603_v1  ;;  %v154_v19 = vmul.f32 %v429_v11, %v603_v1  ;;  %v155_v22 = vmul.f32 %v432_v14, %v603_v1  ;;  %v156_v23 = vmul.f32 %v433_v15, %v603_v1  ;;  %v553_v0 = vld [vmem:[%s1023_s0 + $0x40] sm:$0xff]  }
   0x6   :  { %v220_v20 = vadd.f32 %v617_v7, %v149_v12  ;;  %v221_v21 = vadd.f32 %v617_v7, %v150_v13  ;;  %v222_v24 = vadd.f32 %v617_v7, %v151_v16  ;;  %v223_v25 = vadd.f32 %v617_v7, %v152_v17  ;;  %v556_v13 = vld [vmem:[%s1023_s0 + $0x58] sm:$0xff]  }
   0x7   :  { %v224_v26 = vadd.f32 %v617_v7, %v153_v18  ;;  %v225_v27 = vadd.f32 %v617_v7, %v154_v19  ;;  %v226_v31 = vadd.f32 %v617_v7, %v155_v22  ;;  %v227_v32 = vadd.f32 %v617_v7, %v156_v23 }
   0x8   :  { %v284_v29 = vmax.f32 %v220_v20, 0.0  ;;  %v285_v30 = vmax.f32 %v221_v21, 0.0  ;;  %v286_v35 = vmax.f32 %v222_v24, 0.0  ;;  %v287_v36 = vmax.f32 %v223_v25, 0.0 }
   0x9   :  { %v288_v37 = vmax.f32 %v224_v26, 0.0  ;;  %v289_v38 = vmax.f32 %v225_v27, 0.0  ;;  %v290_v40 = vmax.f32 %v226_v31, 0.0  ;;  %v291_v41 = vmax.f32 %v227_v32, 0.0 }
   0xa   :  { %348 = vst [vmem:[%s1026_s3] sm:$0xff] %v284_v29  ;;  %349 = vst [vmem:[%s1026_s3 + $0x8] sm:$0xff] %v285_v30  ;;  %v436_v42 = vunpack.c.l.bf16 %v549_v28  ;;  %v437_v43 = vunpack.c.h.bf16 %v549_v28  ;;  %v440_v44 = vunpack.c.l.bf16 %v550_v33  ;;  %v441_v45 = vunpack.c.h.bf16 %v550_v33 }
   0xb   :  { %350 = vst [vmem:[%s1026_s3 + $0x10] sm:$0xff] %v286_v35  ;;  %351 = vst [vmem:[%s1026_s3 + $0x18] sm:$0xff] %v287_v36  ;;  %v444_v46 = vunpack.c.l.bf16 %v551_v34  ;;  %v445_v47 = vunpack.c.h.bf16 %v551_v34  ;;  %v448_v50 = vunpack.c.l.bf16 %v552_v39  ;;  %v449_v51 = vunpack.c.h.bf16 %v552_v39 }
   0xc   :  { %352 = vst [vmem:[%s1026_s3 + $0x20] sm:$0xff] %v288_v37  ;;  %353 = vst [vmem:[%s1026_s3 + $0x28] sm:$0xff] %v289_v38  ;;  %v157_v48 = vmul.f32 %v436_v42, %v603_v1  ;;  %v158_v49 = vmul.f32 %v437_v43, %v603_v1  ;;  %v159_v52 = vmul.f32 %v440_v44, %v603_v1  ;;  %v452_v16 = vunpack.c.l.bf16 %v553_v0  ;;  %v557_v38 = vld [vmem:[%s1023_s0 + $0x60] sm:$0xff]   ;;  %v558_v43 = vld [vmem:[%s1023_s0 + $0x68] sm:$0xff]  }
   0xd   :  { %354 = vst [vmem:[%s1026_s3 + $0x30] sm:$0xff] %v290_v40  ;;  %355 = vst [vmem:[%s1026_s3 + $0x38] sm:$0xff] %v291_v41  ;;  %v160_v53 = vmul.f32 %v441_v45, %v603_v1  ;;  %v161_v54 = vmul.f32 %v444_v46, %v603_v1  ;;  %v162_v55 = vmul.f32 %v445_v47, %v603_v1  ;;  %v453_v17 = vunpack.c.h.bf16 %v553_v0  ;;  %v559_v44 = vld [vmem:[%s1023_s0 + $0x70] sm:$0xff]  }
   0xe   :  { %v228_v56 = vadd.f32 %v617_v7, %v157_v48  ;;  %v229_v57 = vadd.f32 %v617_v7, %v158_v49  ;;  %v163_v58 = vmul.f32 %v448_v50, %v603_v1  ;;  %v164_v59 = vmul.f32 %v449_v51, %v603_v1  ;;  %v560_v49 = vld [vmem:[%s1023_s0 + $0x78] sm:$0xff]  }
   0xf   :  { %v230_v60 = vadd.f32 %v617_v7, %v159_v52  ;;  %v231_v61 = vadd.f32 %v617_v7, %v160_v53  ;;  %v232_v62 = vadd.f32 %v617_v7, %v161_v54  ;;  %v233_v63 = vadd.f32 %v617_v7, %v162_v55 }
  0x10   :  { %v292_v2 = vmax.f32 %v228_v56, 0.0  ;;  %v293_v3 = vmax.f32 %v229_v57, 0.0  ;;  %v234_v4 = vadd.f32 %v617_v7, %v163_v58  ;;  %v235_v5 = vadd.f32 %v617_v7, %v164_v59 }
  0x11   :  { %v294_v9 = vmax.f32 %v230_v60, 0.0  ;;  %v295_v10 = vmax.f32 %v231_v61, 0.0  ;;  %v296_v11 = vmax.f32 %v232_v62, 0.0  ;;  %v297_v12 = vmax.f32 %v233_v63, 0.0 }
  0x12   :  { %356 = vst [vmem:[%s1026_s3 + $0x40] sm:$0xff] %v292_v2  ;;  %357 = vst [vmem:[%s1026_s3 + $0x48] sm:$0xff] %v293_v3  ;;  %v298_v14 = vmax.f32 %v234_v4, 0.0  ;;  %v299_v15 = vmax.f32 %v235_v5, 0.0  ;;  %v456_v18 = vunpack.c.l.bf16 %v554_v6  ;;  %v457_v19 = vunpack.c.h.bf16 %v554_v6 }
  0x13   :  { %358 = vst [vmem:[%s1026_s3 + $0x50] sm:$0xff] %v294_v9  ;;  %359 = vst [vmem:[%s1026_s3 + $0x58] sm:$0xff] %v295_v10  ;;  %v460_v20 = vunpack.c.l.bf16 %v555_v8  ;;  %v461_v21 = vunpack.c.h.bf16 %v555_v8  ;;  %v165_v22 = vmul.f32 %v452_v16, %v603_v1  ;;  %v166_v23 = vmul.f32 %v453_v17, %v603_v1  ;;  %v562_v17 = vld [vmem:[%s1023_s0 + $0x88] sm:$0xff]  }
  0x14   :  { %360 = vst [vmem:[%s1026_s3 + $0x60] sm:$0xff] %v296_v11  ;;  %361 = vst [vmem:[%s1026_s3 + $0x68] sm:$0xff] %v297_v12  ;;  %v464_v24 = vunpack.c.l.bf16 %v556_v13  ;;  %v465_v25 = vunpack.c.h.bf16 %v556_v13  ;;  %v167_v26 = vmul.f32 %v456_v18, %v603_v1  ;;  %v168_v27 = vmul.f32 %v457_v19, %v603_v1  ;;  %v561_v12 = vld [vmem:[%s1023_s0 + $0x80] sm:$0xff]   ;;  %v563_v18 = vld [vmem:[%s1023_s0 + $0x90] sm:$0xff]  }
  0x15   :  { %362 = vst [vmem:[%s1026_s3 + $0x70] sm:$0xff] %v298_v14  ;;  %363 = vst [vmem:[%s1026_s3 + $0x78] sm:$0xff] %v299_v15  ;;  %v169_v28 = vmul.f32 %v460_v20, %v603_v1  ;;  %v170_v29 = vmul.f32 %v461_v21, %v603_v1  ;;  %v236_v30 = vadd.f32 %v617_v7, %v165_v22  ;;  %v468_v52 = vunpack.c.l.bf16 %v557_v38 }
  0x16   :  { %v237_v31 = vadd.f32 %v617_v7, %v166_v23  ;;  %v171_v32 = vmul.f32 %v464_v24, %v603_v1  ;;  %v172_v33 = vmul.f32 %v465_v25, %v603_v1  ;;  %v238_v34 = vadd.f32 %v617_v7, %v167_v26  ;;  %v564_v23 = vld [vmem:[%s1023_s0 + $0x98] sm:$0xff]  }
  0x17   :  { %v239_v35 = vadd.f32 %v617_v7, %v168_v27  ;;  %v240_v36 = vadd.f32 %v617_v7, %v169_v28  ;;  %v241_v37 = vadd.f32 %v617_v7, %v170_v29  ;;  %v300_v39 = vmax.f32 %v236_v30, 0.0 }
  0x18   :  { %v301_v40 = vmax.f32 %v237_v31, 0.0  ;;  %v242_v41 = vadd.f32 %v617_v7, %v171_v32  ;;  %v243_v42 = vadd.f32 %v617_v7, %v172_v33  ;;  %v302_v45 = vmax.f32 %v238_v34, 0.0 }
  0x19   :  { %v303_v46 = vmax.f32 %v239_v35, 0.0  ;;  %v304_v47 = vmax.f32 %v240_v36, 0.0  ;;  %v305_v48 = vmax.f32 %v241_v37, 0.0  ;;  %364 = vst [vmem:[%s1026_s3 + $0x80] sm:$0xff] %v300_v39  ;;  %v469_v53 = vunpack.c.h.bf16 %v557_v38 }
  0x1a   :  { %365 = vst [vmem:[%s1026_s3 + $0x88] sm:$0xff] %v301_v40  ;;  %v306_v50 = vmax.f32 %v242_v41, 0.0  ;;  %v307_v51 = vmax.f32 %v243_v42, 0.0  ;;  %366 = vst [vmem:[%s1026_s3 + $0x90] sm:$0xff] %v302_v45  ;;  %v472_v54 = vunpack.c.l.bf16 %v558_v43  ;;  %v473_v55 = vunpack.c.h.bf16 %v558_v43 }
  0x1b   :  { %367 = vst [vmem:[%s1026_s3 + $0x98] sm:$0xff] %v303_v46  ;;  %368 = vst [vmem:[%s1026_s3 + $0xa0] sm:$0xff] %v304_v47  ;;  %v476_v56 = vunpack.c.l.bf16 %v559_v44  ;;  %v477_v57 = vunpack.c.h.bf16 %v559_v44  ;;  %v173_v58 = vmul.f32 %v468_v52, %v603_v1  ;;  %v174_v59 = vmul.f32 %v469_v53, %v603_v1  ;;  %v566_v53 = vld [vmem:[%s1023_s0 + $0xa8] sm:$0xff]  }
  0x1c   :  { %369 = vst [vmem:[%s1026_s3 + $0xa8] sm:$0xff] %v305_v48  ;;  %370 = vst [vmem:[%s1026_s3 + $0xb0] sm:$0xff] %v306_v50  ;;  %v480_v60 = vunpack.c.l.bf16 %v560_v49  ;;  %v481_v61 = vunpack.c.h.bf16 %v560_v49  ;;  %v175_v62 = vmul.f32 %v472_v54, %v603_v1  ;;  %v176_v63 = vmul.f32 %v473_v55, %v603_v1  ;;  %v565_v48 = vld [vmem:[%s1023_s0 + $0xa0] sm:$0xff]   ;;  %v567_v54 = vld [vmem:[%s1023_s0 + $0xb0] sm:$0xff]  }
  0x1d   :  { %371 = vst [vmem:[%s1026_s3 + $0xb8] sm:$0xff] %v307_v51  ;;  %v177_v0 = vmul.f32 %v476_v56, %v603_v1  ;;  %v178_v2 = vmul.f32 %v477_v57, %v603_v1  ;;  %v244_v3 = vadd.f32 %v617_v7, %v173_v58  ;;  %v245_v4 = vadd.f32 %v617_v7, %v174_v59  ;;  %v568_v59 = vld [vmem:[%s1023_s0 + $0xb8] sm:$0xff]  }
  0x1e   :  { %v179_v5 = vmul.f32 %v480_v60, %v603_v1  ;;  %v180_v6 = vmul.f32 %v481_v61, %v603_v1  ;;  %v246_v8 = vadd.f32 %v617_v7, %v175_v62  ;;  %v247_v9 = vadd.f32 %v617_v7, %v176_v63 }
  0x1f   :  { %v248_v10 = vadd.f32 %v617_v7, %v177_v0  ;;  %v249_v11 = vadd.f32 %v617_v7, %v178_v2  ;;  %v308_v13 = vmax.f32 %v244_v3, 0.0  ;;  %v309_v14 = vmax.f32 %v245_v4, 0.0 }
  0x20   :  { %v250_v15 = vadd.f32 %v617_v7, %v179_v5  ;;  %v251_v16 = vadd.f32 %v617_v7, %v180_v6  ;;  %v310_v19 = vmax.f32 %v246_v8, 0.0  ;;  %v311_v20 = vmax.f32 %v247_v9, 0.0 }
  0x21   :  { %v312_v21 = vmax.f32 %v248_v10, 0.0  ;;  %v313_v22 = vmax.f32 %v249_v11, 0.0  ;;  %372 = vst [vmem:[%s1026_s3 + $0xc0] sm:$0xff] %v308_v13  ;;  %373 = vst [vmem:[%s1026_s3 + $0xc8] sm:$0xff] %v309_v14  ;;  %v484_v26 = vunpack.c.l.bf16 %v561_v12  ;;  %v485_v27 = vunpack.c.h.bf16 %v561_v12 }
  0x22   :  { %v314_v24 = vmax.f32 %v250_v15, 0.0  ;;  %v315_v25 = vmax.f32 %v251_v16, 0.0  ;;  %374 = vst [vmem:[%s1026_s3 + $0xd0] sm:$0xff] %v310_v19  ;;  %375 = vst [vmem:[%s1026_s3 + $0xd8] sm:$0xff] %v311_v20  ;;  %v488_v28 = vunpack.c.l.bf16 %v562_v17  ;;  %v489_v29 = vunpack.c.h.bf16 %v562_v17 }
  0x23   :  { %376 = vst [vmem:[%s1026_s3 + $0xe0] sm:$0xff] %v312_v21  ;;  %377 = vst [vmem:[%s1026_s3 + $0xe8] sm:$0xff] %v313_v22  ;;  %v492_v30 = vunpack.c.l.bf16 %v563_v18  ;;  %v493_v31 = vunpack.c.h.bf16 %v563_v18  ;;  %v181_v32 = vmul.f32 %v484_v26, %v603_v1  ;;  %v182_v33 = vmul.f32 %v485_v27, %v603_v1  ;;  %v569_v22 = vld [vmem:[%s1023_s0 + $0xc0] sm:$0xff]   ;;  %v570_v27 = vld [vmem:[%s1023_s0 + $0xc8] sm:$0xff]  }
  0x24   :  { %378 = vst [vmem:[%s1026_s3 + $0xf0] sm:$0xff] %v314_v24  ;;  %379 = vst [vmem:[%s1026_s3 + $0xf8] sm:$0xff] %v315_v25  ;;  %v496_v34 = vunpack.c.l.bf16 %v564_v23  ;;  %v497_v35 = vunpack.c.h.bf16 %v564_v23  ;;  %v183_v36 = vmul.f32 %v488_v28, %v603_v1  ;;  %v184_v37 = vmul.f32 %v489_v29, %v603_v1  ;;  %v571_v28 = vld [vmem:[%s1023_s0 + $0xd0] sm:$0xff]  }
  0x25   :  { %v185_v38 = vmul.f32 %v492_v30, %v603_v1  ;;  %v186_v39 = vmul.f32 %v493_v31, %v603_v1  ;;  %v252_v40 = vadd.f32 %v617_v7, %v181_v32  ;;  %v253_v41 = vadd.f32 %v617_v7, %v182_v33  ;;  %v572_v33 = vld [vmem:[%s1023_s0 + $0xd8] sm:$0xff]  }
  0x26   :  { %v187_v42 = vmul.f32 %v496_v34, %v603_v1  ;;  %v188_v43 = vmul.f32 %v497_v35, %v603_v1  ;;  %v254_v44 = vadd.f32 %v617_v7, %v183_v36  ;;  %v255_v45 = vadd.f32 %v617_v7, %v184_v37 }
  0x27   :  { %v256_v46 = vadd.f32 %v617_v7, %v185_v38  ;;  %v257_v47 = vadd.f32 %v617_v7, %v186_v39  ;;  %v316_v49 = vmax.f32 %v252_v40, 0.0  ;;  %v317_v50 = vmax.f32 %v253_v41, 0.0 }
  0x28   :  { %v258_v51 = vadd.f32 %v617_v7, %v187_v42  ;;  %v259_v52 = vadd.f32 %v617_v7, %v188_v43  ;;  %v318_v55 = vmax.f32 %v254_v44, 0.0  ;;  %v319_v56 = vmax.f32 %v255_v45, 0.0 }
  0x29   :  { %v320_v57 = vmax.f32 %v256_v46, 0.0  ;;  %v321_v58 = vmax.f32 %v257_v47, 0.0  ;;  %380 = vst [vmem:[%s1026_s3 + $0x100] sm:$0xff] %v316_v49  ;;  %381 = vst [vmem:[%s1026_s3 + $0x108] sm:$0xff] %v317_v50  ;;  %v500_v62 = vunpack.c.l.bf16 %v565_v48  ;;  %v501_v63 = vunpack.c.h.bf16 %v565_v48 }
  0x2a   :  { %v322_v60 = vmax.f32 %v258_v51, 0.0  ;;  %v323_v61 = vmax.f32 %v259_v52, 0.0  ;;  %382 = vst [vmem:[%s1026_s3 + $0x110] sm:$0xff] %v318_v55  ;;  %383 = vst [vmem:[%s1026_s3 + $0x118] sm:$0xff] %v319_v56  ;;  %v504_v0 = vunpack.c.l.bf16 %v566_v53  ;;  %v505_v2 = vunpack.c.h.bf16 %v566_v53 }
  0x2b   :  { %384 = vst [vmem:[%s1026_s3 + $0x120] sm:$0xff] %v320_v57  ;;  %385 = vst [vmem:[%s1026_s3 + $0x128] sm:$0xff] %v321_v58  ;;  %v508_v3 = vunpack.c.l.bf16 %v567_v54  ;;  %v509_v4 = vunpack.c.h.bf16 %v567_v54  ;;  %v189_v5 = vmul.f32 %v500_v62, %v603_v1  ;;  %v190_v6 = vmul.f32 %v501_v63, %v603_v1  ;;  %v573_v58 = vld [vmem:[%s1023_s0 + $0xe0] sm:$0xff]   ;;  %v574_v63 = vld [vmem:[%s1023_s0 + $0xe8] sm:$0xff]  }
  0x2c   :  { %386 = vst [vmem:[%s1026_s3 + $0x130] sm:$0xff] %v322_v60  ;;  %387 = vst [vmem:[%s1026_s3 + $0x138] sm:$0xff] %v323_v61  ;;  %v512_v8 = vunpack.c.l.bf16 %v568_v59  ;;  %v513_v9 = vunpack.c.h.bf16 %v568_v59  ;;  %v191_v10 = vmul.f32 %v504_v0, %v603_v1  ;;  %v192_v11 = vmul.f32 %v505_v2, %v603_v1  ;;  %v575_v0 = vld [vmem:[%s1023_s0 + $0xf0] sm:$0xff]  }
  0x2d   :  { %v193_v12 = vmul.f32 %v508_v3, %v603_v1  ;;  %v194_v13 = vmul.f32 %v509_v4, %v603_v1  ;;  %v260_v14 = vadd.f32 %v617_v7, %v189_v5  ;;  %v261_v15 = vadd.f32 %v617_v7, %v190_v6  ;;  %v576_v6 = vld [vmem:[%s1023_s0 + $0xf8] sm:$0xff]  }
  0x2e   :  { %v195_v16 = vmul.f32 %v512_v8, %v603_v1  ;;  %v196_v17 = vmul.f32 %v513_v9, %v603_v1  ;;  %v262_v18 = vadd.f32 %v617_v7, %v191_v10  ;;  %v263_v19 = vadd.f32 %v617_v7, %v192_v11 }
  0x2f   :  { %v264_v20 = vadd.f32 %v617_v7, %v193_v12  ;;  %v265_v21 = vadd.f32 %v617_v7, %v194_v13  ;;  %v324_v23 = vmax.f32 %v260_v14, 0.0  ;;  %v325_v24 = vmax.f32 %v261_v15, 0.0 }
  0x30   :  { %v266_v25 = vadd.f32 %v617_v7, %v195_v16  ;;  %v267_v26 = vadd.f32 %v617_v7, %v196_v17  ;;  %v326_v29 = vmax.f32 %v262_v18, 0.0  ;;  %v327_v30 = vmax.f32 %v263_v19, 0.0 }
  0x31   :  { %v328_v31 = vmax.f32 %v264_v20, 0.0  ;;  %v329_v32 = vmax.f32 %v265_v21, 0.0  ;;  %388 = vst [vmem:[%s1026_s3 + $0x140] sm:$0xff] %v324_v23  ;;  %389 = vst [vmem:[%s1026_s3 + $0x148] sm:$0xff] %v325_v24  ;;  %v516_v36 = vunpack.c.l.bf16 %v569_v22  ;;  %v517_v37 = vunpack.c.h.bf16 %v569_v22 }
  0x32   :  { %v330_v34 = vmax.f32 %v266_v25, 0.0  ;;  %v331_v35 = vmax.f32 %v267_v26, 0.0  ;;  %390 = vst [vmem:[%s1026_s3 + $0x150] sm:$0xff] %v326_v29  ;;  %391 = vst [vmem:[%s1026_s3 + $0x158] sm:$0xff] %v327_v30  ;;  %v520_v38 = vunpack.c.l.bf16 %v570_v27  ;;  %v521_v39 = vunpack.c.h.bf16 %v570_v27 }
  0x33   :  { %392 = vst [vmem:[%s1026_s3 + $0x160] sm:$0xff] %v328_v31  ;;  %393 = vst [vmem:[%s1026_s3 + $0x168] sm:$0xff] %v329_v32  ;;  %v524_v40 = vunpack.c.l.bf16 %v571_v28  ;;  %v525_v41 = vunpack.c.h.bf16 %v571_v28  ;;  %v197_v42 = vmul.f32 %v516_v36, %v603_v1  ;;  %v198_v43 = vmul.f32 %v517_v37, %v603_v1 }
  0x34   :  { %394 = vst [vmem:[%s1026_s3 + $0x170] sm:$0xff] %v330_v34  ;;  %395 = vst [vmem:[%s1026_s3 + $0x178] sm:$0xff] %v331_v35  ;;  %v528_v44 = vunpack.c.l.bf16 %v572_v33  ;;  %v529_v45 = vunpack.c.h.bf16 %v572_v33  ;;  %v199_v46 = vmul.f32 %v520_v38, %v603_v1  ;;  %v200_v47 = vmul.f32 %v521_v39, %v603_v1 }
  0x35   :  { %v201_v48 = vmul.f32 %v524_v40, %v603_v1  ;;  %v202_v49 = vmul.f32 %v525_v41, %v603_v1  ;;  %v268_v50 = vadd.f32 %v617_v7, %v197_v42  ;;  %v269_v51 = vadd.f32 %v617_v7, %v198_v43 }
  0x36   :  { %v203_v52 = vmul.f32 %v528_v44, %v603_v1  ;;  %v204_v53 = vmul.f32 %v529_v45, %v603_v1  ;;  %v270_v54 = vadd.f32 %v617_v7, %v199_v46  ;;  %v271_v55 = vadd.f32 %v617_v7, %v200_v47 }
  0x37   :  { %v272_v56 = vadd.f32 %v617_v7, %v201_v48  ;;  %v273_v57 = vadd.f32 %v617_v7, %v202_v49  ;;  %v332_v59 = vmax.f32 %v268_v50, 0.0  ;;  %v333_v60 = vmax.f32 %v269_v51, 0.0 }
  0x38   :  { %v274_v61 = vadd.f32 %v617_v7, %v203_v52  ;;  %v275_v62 = vadd.f32 %v617_v7, %v204_v53  ;;  %v334_v2 = vmax.f32 %v270_v54, 0.0  ;;  %v335_v3 = vmax.f32 %v271_v55, 0.0 }
  0x39   :  { %v336_v4 = vmax.f32 %v272_v56, 0.0  ;;  %v337_v5 = vmax.f32 %v273_v57, 0.0  ;;  %396 = vst [vmem:[%s1026_s3 + $0x180] sm:$0xff] %v332_v59  ;;  %397 = vst [vmem:[%s1026_s3 + $0x188] sm:$0xff] %v333_v60  ;;  %v532_v10 = vunpack.c.l.bf16 %v573_v58  ;;  %v533_v11 = vunpack.c.h.bf16 %v573_v58 }
  0x3a   :  { %v338_v8 = vmax.f32 %v274_v61, 0.0  ;;  %v339_v9 = vmax.f32 %v275_v62, 0.0  ;;  %398 = vst [vmem:[%s1026_s3 + $0x190] sm:$0xff] %v334_v2  ;;  %399 = vst [vmem:[%s1026_s3 + $0x198] sm:$0xff] %v335_v3  ;;  %v536_v12 = vunpack.c.l.bf16 %v574_v63  ;;  %v537_v13 = vunpack.c.h.bf16 %v574_v63 }
  0x3b   :  { %400 = vst [vmem:[%s1026_s3 + $0x1a0] sm:$0xff] %v336_v4  ;;  %401 = vst [vmem:[%s1026_s3 + $0x1a8] sm:$0xff] %v337_v5  ;;  %v540_v14 = vunpack.c.l.bf16 %v575_v0  ;;  %v541_v15 = vunpack.c.h.bf16 %v575_v0  ;;  %v205_v16 = vmul.f32 %v532_v10, %v603_v1  ;;  %v206_v17 = vmul.f32 %v533_v11, %v603_v1 }
  0x3c   :  { %402 = vst [vmem:[%s1026_s3 + $0x1b0] sm:$0xff] %v338_v8  ;;  %403 = vst [vmem:[%s1026_s3 + $0x1b8] sm:$0xff] %v339_v9  ;;  %v544_v18 = vunpack.c.l.bf16 %v576_v6  ;;  %v545_v19 = vunpack.c.h.bf16 %v576_v6  ;;  %v207_v20 = vmul.f32 %v536_v12, %v603_v1  ;;  %v208_v21 = vmul.f32 %v537_v13, %v603_v1 }
  0x3d   :  { %v209_v22 = vmul.f32 %v540_v14, %v603_v1  ;;  %v210_v23 = vmul.f32 %v541_v15, %v603_v1  ;;  %v276_v24 = vadd.f32 %v617_v7, %v205_v16  ;;  %v277_v25 = vadd.f32 %v617_v7, %v206_v17 }
  0x3e   :  { %v211_v26 = vmul.f32 %v544_v18, %v603_v1  ;;  %v212_v27 = vmul.f32 %v545_v19, %v603_v1  ;;  %v278_v28 = vadd.f32 %v617_v7, %v207_v20  ;;  %v279_v29 = vadd.f32 %v617_v7, %v208_v21 }
  0x3f   :  { %v280_v30 = vadd.f32 %v617_v7, %v209_v22  ;;  %v281_v31 = vadd.f32 %v617_v7, %v210_v23  ;;  %v340_v32 = vmax.f32 %v276_v24, 0.0  ;;  %v341_v33 = vmax.f32 %v277_v25, 0.0 }
  0x40   :  { %v282_v34 = vadd.f32 %v617_v7, %v211_v26  ;;  %v283_v35 = vadd.f32 %v617_v7, %v212_v27  ;;  %v342_v36 = vmax.f32 %v278_v28, 0.0  ;;  %v343_v37 = vmax.f32 %v279_v29, 0.0 }
  0x41   :  { %v344_v38 = vmax.f32 %v280_v30, 0.0  ;;  %v345_v39 = vmax.f32 %v281_v31, 0.0  ;;  %404 = vst [vmem:[%s1026_s3 + $0x1c0] sm:$0xff] %v340_v32  ;;  %405 = vst [vmem:[%s1026_s3 + $0x1c8] sm:$0xff] %v341_v33 }
  0x42   :  { %v346_v1 = vmax.f32 %v282_v34, 0.0  ;;  %v347_v40 = vmax.f32 %v283_v35, 0.0  ;;  %406 = vst [vmem:[%s1026_s3 + $0x1d0] sm:$0xff] %v342_v36  ;;  %407 = vst [vmem:[%s1026_s3 + $0x1d8] sm:$0xff] %v343_v37 }
  0x43   :  { %408 = vst [vmem:[%s1026_s3 + $0x1e0] sm:$0xff] %v344_v38  ;;  %409 = vst [vmem:[%s1026_s3 + $0x1e8] sm:$0xff] %v345_v39 }
  0x44   :  { %410 = vst [vmem:[%s1026_s3 + $0x1f0] sm:$0xff] %v346_v1  ;;  %411 = vst [vmem:[%s1026_s3 + $0x1f8] sm:$0xff] %v347_v40 }

</bundles_post_ra>
